<compile_context>
chip_gen: v7x
topology: tpu7x:2x2x1
jax: 0.10.0
libtpu: 0.0.40
codegen_flags: <defaults>
</compile_context>

<pallas_src>
import math

import jax
import jax.numpy as jnp
from jax.experimental import pallas as pl
from jax.experimental.pallas import tpu as pltpu


_LANES = 128                # f32 lane width (fast vreg axis)
_MAX_SUB = 64               # max sublane rows per grid step (64*128 = 8192 rows)
_P_ROWS, _P_COLS = 16, 8    # packed-parameter table shape (4 rows per layer)


def _mlp_kernel(x_ref, p_ref, y_ref):
    """One lane-dense batch tile of the 4-layer MLP, entirely on the VPU.

    x_ref : (3, SUB, 128) VMEM  -- feature-major batch tile (batch in lanes/sublanes)
    p_ref : (16, 8)       SMEM  -- packed weights/biases, read as scalars
    y_ref : (SUB, 128)    VMEM  -- lane-dense output tile
    """
    h = (x_ref[0], x_ref[1], x_ref[2])          # three (SUB, 128) slabs

    def dense(h, row0, n_out, relu):
        # layer rows: row0+k (k=0..2) -> W[k, :], row0+3 -> bias
        outs = []
        for j in range(n_out):
            acc = h[0] * p_ref[row0 + 0, j] + p_ref[row0 + 3, j]   # FMA + bias
            acc = acc + h[1] * p_ref[row0 + 1, j]
            acc = acc + h[2] * p_ref[row0 + 2, j]
            outs.append(jnp.maximum(acc, 0.0) if relu else acc)
        return tuple(outs)

    h = dense(h, 0, 3, True)        # Linear(3, 3) + ReLU
    h = dense(h, 4, 3, True)        # Linear(3, 3) + ReLU
    h = dense(h, 8, 3, True)        # Linear(3, 3) + ReLU
    y = dense(h, 12, 1, False)      # Linear(3, 1)
    y_ref[...] = y[0]               # full-tile unmasked store


def pack_params(layers):
    """Pack [(W(in,out), b(out,)), ...] into one (16, 8) f32 table.

    Layer l occupies rows 4*l .. 4*l+3:
      rows 4l .. 4l+2, cols 0:n_out -> W  (stored in (in, out) layout)
      row  4l+3,       cols 0:n_out -> b
    """
    P = jnp.zeros((_P_ROWS, _P_COLS), jnp.float32)
    for l, (w, b) in enumerate(layers):
        n_in, n_out = w.shape
        r = 4 * l
        P = P.at[r:r + n_in, :n_out].set(w.astype(jnp.float32))
        P = P.at[r + 3, :n_out].set(b.astype(jnp.float32))
    return P


def _tile_sub(n_rows):
    """Sublane-row tile: multiple of 8 (f32 sublane count), capped at _MAX_SUB."""
    sub = min(_MAX_SUB, max(8, n_rows))
    return (sub // 8) * 8


@jax.jit
def response_forward(x, packed_params):
    """ResponseModel.forward: x (B, 3) -> (B, 1)."""
    x = x.astype(jnp.float32)
    B = x.shape[0]

    rows = pl.cdiv(B, _LANES)                 # 128-wide batch rows needed
    sub = _tile_sub(rows)                     # sublane rows per grid step
    rows_pad = pl.cdiv(rows, sub) * sub
    B_pad = rows_pad * _LANES
    if B_pad != B:
        x = jnp.pad(x, ((0, B_pad - B), (0, 0)))

    # Feature-major, lane-dense layout: batch element b lives at [:, b // 128, b % 128].
    xt = x.T.reshape(3, rows_pad, _LANES)

    y = pl.pallas_call(
        _mlp_kernel,
        out_shape=jax.ShapeDtypeStruct((rows_pad, _LANES), jnp.float32),
        grid=(rows_pad // sub,),
        in_specs=[
            pl.BlockSpec((3, sub, _LANES), lambda i: (0, i, 0)),        # batch tile
            pl.BlockSpec(memory_space=pltpu.MemorySpace.SMEM),          # param table
        ],
        out_specs=pl.BlockSpec((sub, _LANES), lambda i: (i, 0)),
        compiler_params=pltpu.CompilerParams(
            dimension_semantics=("parallel",)),
    )(xt, packed_params)

    return y.reshape(B_pad, 1)[:B]


def init_params(key):
    """Deterministic PyTorch-Linear-style init (uniform +/- 1/sqrt(fan_in))."""
    dims = [(3, 3), (3, 3), (3, 3), (3, 1)]
    keys = jax.random.split(key, 2 * len(dims))
    layers = []
    for l, (fan_in, fan_out) in enumerate(dims):
        bound = 1.0 / math.sqrt(fan_in)
        w = jax.random.uniform(keys[2 * l], (fan_in, fan_out), jnp.float32,
                               -bound, bound)
        b = jax.random.uniform(keys[2 * l + 1], (fan_out,), jnp.float32,
                               -bound, bound)
        layers.append((w, b))
    return layers


if __name__ == "__main__":
    key = jax.random.PRNGKey(0)
    k_x, k_p = jax.random.split(key)

    B = 16
    x = jax.random.normal(k_x, (B, 3), jnp.float32)
    layers = init_params(k_p)
    packed = pack_params(layers)

    y = response_forward(x, packed)
    jax.block_until_ready(y)

    # Pure-JAX reference check
    h_ref = x
    for i, (w, b) in enumerate(layers):
        h_ref = h_ref @ w + b
        if i < len(layers) - 1:
            h_ref = jnp.maximum(h_ref, 0.0)

    assert y.shape == (B, 1), f"bad output shape {y.shape}"
    assert jnp.allclose(y, h_ref, atol=1e-5, rtol=1e-5), "output mismatch"

    print("KERNEL_OK")
</pallas_src>

<mosaic_0001>
module attributes {stable_mosaic.version = 11 : i64} {
  func.func @_mlp_kernel(%arg0: i32, %arg1: memref<3x8x128xf32, #tpu.memory_space<vmem>>, %arg2: memref<16x8xf32, #tpu.memory_space<smem>>, %arg3: memref<8x128xf32, #tpu.memory_space<vmem>>) attributes {dimension_semantics = [#tpu.dimension_semantics<parallel>], iteration_bounds = array<i64: 1>, scalar_prefetch = 0 : i64, scratch_operands = 0 : i64, tpu.core_type = #tpu.core_type<tc>, window_params = [{transform_indices = @transform_0, window_bounds = array<i64: 3, 8, 128>}, {transform_indices = @transform_1, window_bounds = array<i64: 16, 8>}, {transform_indices = @transform_2, window_bounds = array<i64: 8, 128>}]} {
    %c0 = arith.constant 0 : index
    %c0_0 = arith.constant 0 : index
    %c0_1 = arith.constant 0 : index
    %0 = vector.load %arg1[%c0, %c0_0, %c0_1] : memref<3x8x128xf32, #tpu.memory_space<vmem>>, vector<1x8x128xf32>
    %1 = vector.shape_cast %0 : vector<1x8x128xf32> to vector<8x128xf32>
    %c1 = arith.constant 1 : index
    %c0_2 = arith.constant 0 : index
    %c0_3 = arith.constant 0 : index
    %2 = vector.load %arg1[%c1, %c0_2, %c0_3] : memref<3x8x128xf32, #tpu.memory_space<vmem>>, vector<1x8x128xf32>
    %3 = vector.shape_cast %2 : vector<1x8x128xf32> to vector<8x128xf32>
    %c2 = arith.constant 2 : index
    %c0_4 = arith.constant 0 : index
    %c0_5 = arith.constant 0 : index
    %4 = vector.load %arg1[%c2, %c0_4, %c0_5] : memref<3x8x128xf32, #tpu.memory_space<vmem>>, vector<1x8x128xf32>
    %5 = vector.shape_cast %4 : vector<1x8x128xf32> to vector<8x128xf32>
    %c0_6 = arith.constant 0 : index
    %c0_7 = arith.constant 0 : index
    %6 = memref.load %arg2[%c0_6, %c0_7] : memref<16x8xf32, #tpu.memory_space<smem>>
    %7 = vector.broadcast %6 : f32 to vector<8x128xf32>
    %8 = arith.mulf %1, %7 : vector<8x128xf32>
    %c3 = arith.constant 3 : index
    %c0_8 = arith.constant 0 : index
    %9 = memref.load %arg2[%c3, %c0_8] : memref<16x8xf32, #tpu.memory_space<smem>>
    %10 = vector.broadcast %9 : f32 to vector<8x128xf32>
    %11 = arith.addf %8, %10 : vector<8x128xf32>
    %c1_9 = arith.constant 1 : index
    %c0_10 = arith.constant 0 : index
    %12 = memref.load %arg2[%c1_9, %c0_10] : memref<16x8xf32, #tpu.memory_space<smem>>
    %13 = vector.broadcast %12 : f32 to vector<8x128xf32>
    %14 = arith.mulf %3, %13 : vector<8x128xf32>
    %15 = arith.addf %11, %14 : vector<8x128xf32>
    %c2_11 = arith.constant 2 : index
    %c0_12 = arith.constant 0 : index
    %16 = memref.load %arg2[%c2_11, %c0_12] : memref<16x8xf32, #tpu.memory_space<smem>>
    %17 = vector.broadcast %16 : f32 to vector<8x128xf32>
    %18 = arith.mulf %5, %17 : vector<8x128xf32>
    %19 = arith.addf %15, %18 : vector<8x128xf32>
    %cst = arith.constant 0.000000e+00 : f32
    %20 = vector.broadcast %cst : f32 to vector<8x128xf32>
    %21 = arith.maximumf %19, %20 : vector<8x128xf32>
    %c0_13 = arith.constant 0 : index
    %c1_14 = arith.constant 1 : index
    %22 = memref.load %arg2[%c0_13, %c1_14] : memref<16x8xf32, #tpu.memory_space<smem>>
    %23 = vector.broadcast %22 : f32 to vector<8x128xf32>
    %24 = arith.mulf %1, %23 : vector<8x128xf32>
    %c3_15 = arith.constant 3 : index
    %c1_16 = arith.constant 1 : index
    %25 = memref.load %arg2[%c3_15, %c1_16] : memref<16x8xf32, #tpu.memory_space<smem>>
    %26 = vector.broadcast %25 : f32 to vector<8x128xf32>
    %27 = arith.addf %24, %26 : vector<8x128xf32>
    %c1_17 = arith.constant 1 : index
    %c1_18 = arith.constant 1 : index
    %28 = memref.load %arg2[%c1_17, %c1_18] : memref<16x8xf32, #tpu.memory_space<smem>>
    %29 = vector.broadcast %28 : f32 to vector<8x128xf32>
    %30 = arith.mulf %3, %29 : vector<8x128xf32>
    %31 = arith.addf %27, %30 : vector<8x128xf32>
    %c2_19 = arith.constant 2 : index
    %c1_20 = arith.constant 1 : index
    %32 = memref.load %arg2[%c2_19, %c1_20] : memref<16x8xf32, #tpu.memory_space<smem>>
    %33 = vector.broadcast %32 : f32 to vector<8x128xf32>
    %34 = arith.mulf %5, %33 : vector<8x128xf32>
    %35 = arith.addf %31, %34 : vector<8x128xf32>
    %cst_21 = arith.constant 0.000000e+00 : f32
    %36 = vector.broadcast %cst_21 : f32 to vector<8x128xf32>
    %37 = arith.maximumf %35, %36 : vector<8x128xf32>
    %c0_22 = arith.constant 0 : index
    %c2_23 = arith.constant 2 : index
    %38 = memref.load %arg2[%c0_22, %c2_23] : memref<16x8xf32, #tpu.memory_space<smem>>
    %39 = vector.broadcast %38 : f32 to vector<8x128xf32>
    %40 = arith.mulf %1, %39 : vector<8x128xf32>
    %c3_24 = arith.constant 3 : index
    %c2_25 = arith.constant 2 : index
    %41 = memref.load %arg2[%c3_24, %c2_25] : memref<16x8xf32, #tpu.memory_space<smem>>
    %42 = vector.broadcast %41 : f32 to vector<8x128xf32>
    %43 = arith.addf %40, %42 : vector<8x128xf32>
    %c1_26 = arith.constant 1 : index
    %c2_27 = arith.constant 2 : index
    %44 = memref.load %arg2[%c1_26, %c2_27] : memref<16x8xf32, #tpu.memory_space<smem>>
    %45 = vector.broadcast %44 : f32 to vector<8x128xf32>
    %46 = arith.mulf %3, %45 : vector<8x128xf32>
    %47 = arith.addf %43, %46 : vector<8x128xf32>
    %c2_28 = arith.constant 2 : index
    %c2_29 = arith.constant 2 : index
    %48 = memref.load %arg2[%c2_28, %c2_29] : memref<16x8xf32, #tpu.memory_space<smem>>
    %49 = vector.broadcast %48 : f32 to vector<8x128xf32>
    %50 = arith.mulf %5, %49 : vector<8x128xf32>
    %51 = arith.addf %47, %50 : vector<8x128xf32>
    %cst_30 = arith.constant 0.000000e+00 : f32
    %52 = vector.broadcast %cst_30 : f32 to vector<8x128xf32>
    %53 = arith.maximumf %51, %52 : vector<8x128xf32>
    %c4 = arith.constant 4 : index
    %c0_31 = arith.constant 0 : index
    %54 = memref.load %arg2[%c4, %c0_31] : memref<16x8xf32, #tpu.memory_space<smem>>
    %55 = vector.broadcast %54 : f32 to vector<8x128xf32>
    %56 = arith.mulf %21, %55 : vector<8x128xf32>
    %c7 = arith.constant 7 : index
    %c0_32 = arith.constant 0 : index
    %57 = memref.load %arg2[%c7, %c0_32] : memref<16x8xf32, #tpu.memory_space<smem>>
    %58 = vector.broadcast %57 : f32 to vector<8x128xf32>
    %59 = arith.addf %56, %58 : vector<8x128xf32>
    %c5 = arith.constant 5 : index
    %c0_33 = arith.constant 0 : index
    %60 = memref.load %arg2[%c5, %c0_33] : memref<16x8xf32, #tpu.memory_space<smem>>
    %61 = vector.broadcast %60 : f32 to vector<8x128xf32>
    %62 = arith.mulf %37, %61 : vector<8x128xf32>
    %63 = arith.addf %59, %62 : vector<8x128xf32>
    %c6 = arith.constant 6 : index
    %c0_34 = arith.constant 0 : index
    %64 = memref.load %arg2[%c6, %c0_34] : memref<16x8xf32, #tpu.memory_space<smem>>
    %65 = vector.broadcast %64 : f32 to vector<8x128xf32>
    %66 = arith.mulf %53, %65 : vector<8x128xf32>
    %67 = arith.addf %63, %66 : vector<8x128xf32>
    %cst_35 = arith.constant 0.000000e+00 : f32
    %68 = vector.broadcast %cst_35 : f32 to vector<8x128xf32>
    %69 = arith.maximumf %67, %68 : vector<8x128xf32>
    %c4_36 = arith.constant 4 : index
    %c1_37 = arith.constant 1 : index
    %70 = memref.load %arg2[%c4_36, %c1_37] : memref<16x8xf32, #tpu.memory_space<smem>>
    %71 = vector.broadcast %70 : f32 to vector<8x128xf32>
    %72 = arith.mulf %21, %71 : vector<8x128xf32>
    %c7_38 = arith.constant 7 : index
    %c1_39 = arith.constant 1 : index
    %73 = memref.load %arg2[%c7_38, %c1_39] : memref<16x8xf32, #tpu.memory_space<smem>>
    %74 = vector.broadcast %73 : f32 to vector<8x128xf32>
    %75 = arith.addf %72, %74 : vector<8x128xf32>
    %c5_40 = arith.constant 5 : index
    %c1_41 = arith.constant 1 : index
    %76 = memref.load %arg2[%c5_40, %c1_41] : memref<16x8xf32, #tpu.memory_space<smem>>
    %77 = vector.broadcast %76 : f32 to vector<8x128xf32>
    %78 = arith.mulf %37, %77 : vector<8x128xf32>
    %79 = arith.addf %75, %78 : vector<8x128xf32>
    %c6_42 = arith.constant 6 : index
    %c1_43 = arith.constant 1 : index
    %80 = memref.load %arg2[%c6_42, %c1_43] : memref<16x8xf32, #tpu.memory_space<smem>>
    %81 = vector.broadcast %80 : f32 to vector<8x128xf32>
    %82 = arith.mulf %53, %81 : vector<8x128xf32>
    %83 = arith.addf %79, %82 : vector<8x128xf32>
    %cst_44 = arith.constant 0.000000e+00 : f32
    %84 = vector.broadcast %cst_44 : f32 to vector<8x128xf32>
    %85 = arith.maximumf %83, %84 : vector<8x128xf32>
    %c4_45 = arith.constant 4 : index
    %c2_46 = arith.constant 2 : index
    %86 = memref.load %arg2[%c4_45, %c2_46] : memref<16x8xf32, #tpu.memory_space<smem>>
    %87 = vector.broadcast %86 : f32 to vector<8x128xf32>
    %88 = arith.mulf %21, %87 : vector<8x128xf32>
    %c7_47 = arith.constant 7 : index
    %c2_48 = arith.constant 2 : index
    %89 = memref.load %arg2[%c7_47, %c2_48] : memref<16x8xf32, #tpu.memory_space<smem>>
    %90 = vector.broadcast %89 : f32 to vector<8x128xf32>
    %91 = arith.addf %88, %90 : vector<8x128xf32>
    %c5_49 = arith.constant 5 : index
    %c2_50 = arith.constant 2 : index
    %92 = memref.load %arg2[%c5_49, %c2_50] : memref<16x8xf32, #tpu.memory_space<smem>>
    %93 = vector.broadcast %92 : f32 to vector<8x128xf32>
    %94 = arith.mulf %37, %93 : vector<8x128xf32>
    %95 = arith.addf %91, %94 : vector<8x128xf32>
    %c6_51 = arith.constant 6 : index
    %c2_52 = arith.constant 2 : index
    %96 = memref.load %arg2[%c6_51, %c2_52] : memref<16x8xf32, #tpu.memory_space<smem>>
    %97 = vector.broadcast %96 : f32 to vector<8x128xf32>
    %98 = arith.mulf %53, %97 : vector<8x128xf32>
    %99 = arith.addf %95, %98 : vector<8x128xf32>
    %cst_53 = arith.constant 0.000000e+00 : f32
    %100 = vector.broadcast %cst_53 : f32 to vector<8x128xf32>
    %101 = arith.maximumf %99, %100 : vector<8x128xf32>
    %c8 = arith.constant 8 : index
    %c0_54 = arith.constant 0 : index
    %102 = memref.load %arg2[%c8, %c0_54] : memref<16x8xf32, #tpu.memory_space<smem>>
    %103 = vector.broadcast %102 : f32 to vector<8x128xf32>
    %104 = arith.mulf %69, %103 : vector<8x128xf32>
    %c11 = arith.constant 11 : index
    %c0_55 = arith.constant 0 : index
    %105 = memref.load %arg2[%c11, %c0_55] : memref<16x8xf32, #tpu.memory_space<smem>>
    %106 = vector.broadcast %105 : f32 to vector<8x128xf32>
    %107 = arith.addf %104, %106 : vector<8x128xf32>
    %c9 = arith.constant 9 : index
    %c0_56 = arith.constant 0 : index
    %108 = memref.load %arg2[%c9, %c0_56] : memref<16x8xf32, #tpu.memory_space<smem>>
    %109 = vector.broadcast %108 : f32 to vector<8x128xf32>
    %110 = arith.mulf %85, %109 : vector<8x128xf32>
    %111 = arith.addf %107, %110 : vector<8x128xf32>
    %c10 = arith.constant 10 : index
    %c0_57 = arith.constant 0 : index
    %112 = memref.load %arg2[%c10, %c0_57] : memref<16x8xf32, #tpu.memory_space<smem>>
    %113 = vector.broadcast %112 : f32 to vector<8x128xf32>
    %114 = arith.mulf %101, %113 : vector<8x128xf32>
    %115 = arith.addf %111, %114 : vector<8x128xf32>
    %cst_58 = arith.constant 0.000000e+00 : f32
    %116 = vector.broadcast %cst_58 : f32 to vector<8x128xf32>
    %117 = arith.maximumf %115, %116 : vector<8x128xf32>
    %c8_59 = arith.constant 8 : index
    %c1_60 = arith.constant 1 : index
    %118 = memref.load %arg2[%c8_59, %c1_60] : memref<16x8xf32, #tpu.memory_space<smem>>
    %119 = vector.broadcast %118 : f32 to vector<8x128xf32>
    %120 = arith.mulf %69, %119 : vector<8x128xf32>
    %c11_61 = arith.constant 11 : index
    %c1_62 = arith.constant 1 : index
    %121 = memref.load %arg2[%c11_61, %c1_62] : memref<16x8xf32, #tpu.memory_space<smem>>
    %122 = vector.broadcast %121 : f32 to vector<8x128xf32>
    %123 = arith.addf %120, %122 : vector<8x128xf32>
    %c9_63 = arith.constant 9 : index
    %c1_64 = arith.constant 1 : index
    %124 = memref.load %arg2[%c9_63, %c1_64] : memref<16x8xf32, #tpu.memory_space<smem>>
    %125 = vector.broadcast %124 : f32 to vector<8x128xf32>
    %126 = arith.mulf %85, %125 : vector<8x128xf32>
    %127 = arith.addf %123, %126 : vector<8x128xf32>
    %c10_65 = arith.constant 10 : index
    %c1_66 = arith.constant 1 : index
    %128 = memref.load %arg2[%c10_65, %c1_66] : memref<16x8xf32, #tpu.memory_space<smem>>
    %129 = vector.broadcast %128 : f32 to vector<8x128xf32>
    %130 = arith.mulf %101, %129 : vector<8x128xf32>
    %131 = arith.addf %127, %130 : vector<8x128xf32>
    %cst_67 = arith.constant 0.000000e+00 : f32
    %132 = vector.broadcast %cst_67 : f32 to vector<8x128xf32>
    %133 = arith.maximumf %131, %132 : vector<8x128xf32>
    %c8_68 = arith.constant 8 : index
    %c2_69 = arith.constant 2 : index
    %134 = memref.load %arg2[%c8_68, %c2_69] : memref<16x8xf32, #tpu.memory_space<smem>>
    %135 = vector.broadcast %134 : f32 to vector<8x128xf32>
    %136 = arith.mulf %69, %135 : vector<8x128xf32>
    %c11_70 = arith.constant 11 : index
    %c2_71 = arith.constant 2 : index
    %137 = memref.load %arg2[%c11_70, %c2_71] : memref<16x8xf32, #tpu.memory_space<smem>>
    %138 = vector.broadcast %137 : f32 to vector<8x128xf32>
    %139 = arith.addf %136, %138 : vector<8x128xf32>
    %c9_72 = arith.constant 9 : index
    %c2_73 = arith.constant 2 : index
    %140 = memref.load %arg2[%c9_72, %c2_73] : memref<16x8xf32, #tpu.memory_space<smem>>
    %141 = vector.broadcast %140 : f32 to vector<8x128xf32>
    %142 = arith.mulf %85, %141 : vector<8x128xf32>
    %143 = arith.addf %139, %142 : vector<8x128xf32>
    %c10_74 = arith.constant 10 : index
    %c2_75 = arith.constant 2 : index
    %144 = memref.load %arg2[%c10_74, %c2_75] : memref<16x8xf32, #tpu.memory_space<smem>>
    %145 = vector.broadcast %144 : f32 to vector<8x128xf32>
    %146 = arith.mulf %101, %145 : vector<8x128xf32>
    %147 = arith.addf %143, %146 : vector<8x128xf32>
    %cst_76 = arith.constant 0.000000e+00 : f32
    %148 = vector.broadcast %cst_76 : f32 to vector<8x128xf32>
    %149 = arith.maximumf %147, %148 : vector<8x128xf32>
    %c12 = arith.constant 12 : index
    %c0_77 = arith.constant 0 : index
    %150 = memref.load %arg2[%c12, %c0_77] : memref<16x8xf32, #tpu.memory_space<smem>>
    %151 = vector.broadcast %150 : f32 to vector<8x128xf32>
    %152 = arith.mulf %117, %151 : vector<8x128xf32>
    %c15 = arith.constant 15 : index
    %c0_78 = arith.constant 0 : index
    %153 = memref.load %arg2[%c15, %c0_78] : memref<16x8xf32, #tpu.memory_space<smem>>
    %154 = vector.broadcast %153 : f32 to vector<8x128xf32>
    %155 = arith.addf %152, %154 : vector<8x128xf32>
    %c13 = arith.constant 13 : index
    %c0_79 = arith.constant 0 : index
    %156 = memref.load %arg2[%c13, %c0_79] : memref<16x8xf32, #tpu.memory_space<smem>>
    %157 = vector.broadcast %156 : f32 to vector<8x128xf32>
    %158 = arith.mulf %133, %157 : vector<8x128xf32>
    %159 = arith.addf %155, %158 : vector<8x128xf32>
    %c14 = arith.constant 14 : index
    %c0_80 = arith.constant 0 : index
    %160 = memref.load %arg2[%c14, %c0_80] : memref<16x8xf32, #tpu.memory_space<smem>>
    %161 = vector.broadcast %160 : f32 to vector<8x128xf32>
    %162 = arith.mulf %149, %161 : vector<8x128xf32>
    %163 = arith.addf %159, %162 : vector<8x128xf32>
    %c0_81 = arith.constant 0 : index
    %c0_82 = arith.constant 0 : index
    %164 = vector.load %arg3[%c0_81, %c0_82] : memref<8x128xf32, #tpu.memory_space<vmem>>, vector<8x128xf32>
    tpu.vector_store %arg3[%c0_81, %c0_82], %163 {strides = array<i32>} : memref<8x128xf32, #tpu.memory_space<vmem>>, vector<8x128xf32>,
    return
  }
  func.func @transform_0(%arg0: i32) -> (i32, i32, i32) {
    %c0_i32 = arith.constant 0 : i32
    %c0_i32_0 = arith.constant 0 : i32
    %c0_i32_1 = arith.constant 0 : i32
    return %c0_i32, %arg0, %c0_i32_0 : i32, i32, i32
  }
  func.func @transform_1(%arg0: i32) -> (i32, i32) {
    %c0_i32 = arith.constant 0 : i32
    %c0_i32_0 = arith.constant 0 : i32
    %c0_i32_1 = arith.constant 0 : i32
    return %c0_i32, %c0_i32_0 : i32, i32
  }
  func.func @transform_2(%arg0: i32) -> (i32, i32) {
    %c0_i32 = arith.constant 0 : i32
    %c0_i32_0 = arith.constant 0 : i32
    return %arg0, %c0_i32 : i32, i32
  }
}

</mosaic_0001>

<bundles_post_ra>
// kernel: response_forward.1
= control target key start
LH: loop header
LB: loop body
LE: loop exit
PB: predicated region body
PF: predicated region fallthrough
CT: control target
= control target key end

     0   :  { %7 = vsyncpa [#allocation3], 0  ;;  %s373_s0 = inlined_call_operand.vmem [shape: f32[3,8,128], index: 0, kind: input, shape index: {}]   ;;  %s374_s1 = inlined_call_operand.vmem [shape: f32[16,8], index: 1, kind: input, shape index: {}]   ;;  %s375_s2 = inlined_call_operand.vmem [shape: f32[8,128], index: 2, kind: output, shape index: {}]  }
   0x1   :  { %s15_s11 = sshll.u32 %s374_s1, 4  ;;  %s16_s11 = int_to_ptr.vmem [resolvable:$true] %s15_s11 }
   0x2   :  { %s230_s12 = scalar_lea.vmem %s16_s11, 256  ;;  %p235_p1 = scmp.lt.s32.totalorder %s16_s11, %s16_s11 }
   0x3   :  { %p231_p0 = scmp.ne.s32.totalorder %s16_s11, %s230_s12  ;;  %p236_p2 = scmp.lt.s32.totalorder %s230_s12, %s230_s12 }
   0x5   :  { %p237_p3 = por %p236_p2, %p235_p1 }
   0x7   :  { %p238_p4 = pnand %p237_p3, %p231_p0 }
   0x9   :  { %241 = shalt.err (!%p238_p4)
}
   0xa   :  { %s244_s13 = smov [#allocation2]   ;;  %s245_s14 = smov 128  }
   0xb   :  { %s246_s15 = smov 8  }
   0xc   :  { %21 = dma.vmem_to_smem %s16_s11, 256, %s244_s13, [#allocation3], %s245_s14, %s245_s14, %s246_s15  }
   0xd   :  { %242 = dma.done.wait [#allocation3], 256  }
   0xe   :  { %243 = vsyncadd [#allocation3], 4294967040 }
   0xf   :  { %25 = sfence }
  0x10   :  { %s31_s16 = sld [smem:[#allocation2]]  ;;  %s191_s1 = sld [smem:[#allocation2 + $0x1]]  ;;  %v26_v0 = vld [vmem:[%s373_s0] sm:$0xff]  ;;  %v186_v1 = vld [vmem:[%s373_s0 + $0x8] sm:$0xff]  ;;  %v187_v2 = vld [vmem:[%s373_s0 + $0x10] sm:$0xff] }
  0x11   :  { %s188_s17 = sld [smem:[#allocation2 + $0x180]]  ;;  %s265_s20 = sld [smem:[#allocation2 + $0x181]] }
  0x12   :  { %s189_s18 = sld [smem:[#allocation2 + $0x80]]  ;;  %s267_s21 = sld [smem:[#allocation2 + $0x81]] }
  0x13   :  { %s190_s19 = sld [smem:[#allocation2 + $0x100]]  ;;  %s272_s24 = sld [smem:[#allocation2 + $0x101]] }
  0x14   :  { %s274_s25 = sld [smem:[#allocation2 + $0x2]]  ;;  %s288_s5 = sld [smem:[#allocation2 + $0x200]] }
  0x15   :  { %s279_s28 = sld [smem:[#allocation2 + $0x182]]  ;;  %s290_s6 = sld [smem:[#allocation2 + $0x380]] }
  0x16   :  { %s281_s29 = sld [smem:[#allocation2 + $0x82]]  ;;  %v32_v3 = vstv %s31_s16  ;;  %s292_s7 = sld [smem:[#allocation2 + $0x280]]  ;;  %v47_v9 = vstv %s191_s1 }
  0x17   :  { %s286_s4 = sld [smem:[#allocation2 + $0x102]]  ;;  %v33_v4 = vmul.f32 %v32_v3, %v26_v0  ;;  %v35_v5 = vstv %s188_s17  ;;  %s294_s0 = sld [smem:[#allocation2 + $0x300]]  ;;  %v48_v12 = vmul.f32 %v47_v9, %v26_v0  ;;  %v50_v13 = vstv %s265_s20 }
  0x18   :  { %v38_v6 = vstv %s189_s18  ;;  %s296_s8 = sld [smem:[#allocation2 + $0x201]]  ;;  %v53_v14 = vstv %s267_s21  ;;  %s308_s12 = sld [smem:[#allocation2 + $0x202]] }
  0x19   :  { %v39_v7 = vmul.f32 %v186_v1, %v38_v6  ;;  %v42_v8 = vstv %s190_s19  ;;  %v36_v10 = vadd.f32 %v35_v5, %v33_v4  ;;  %s299_s9 = sld [smem:[#allocation2 + $0x381]]  ;;  %v57_v15 = vstv %s272_s24  ;;  %s310_s13 = sld [smem:[#allocation2 + $0x382]] }
  0x1a   :  { %v43_v11 = vmul.f32 %v187_v2, %v42_v8  ;;  %s301_s10 = sld [smem:[#allocation2 + $0x281]]  ;;  %v62_v16 = vstv %s274_s25  ;;  %v51_v18 = vadd.f32 %v50_v13, %v48_v12  ;;  %v54_v19 = vmul.f32 %v186_v1, %v53_v14  ;;  %s312_s14 = sld [smem:[#allocation2 + $0x282]] }
  0x1b   :  { %s306_s11 = sld [smem:[#allocation2 + $0x301]]  ;;  %v40_v17 = vadd.f32 %v39_v7, %v36_v10  ;;  %v58_v20 = vmul.f32 %v187_v2, %v57_v15  ;;  %v63_v21 = vmul.f32 %v62_v16, %v26_v0  ;;  %v65_v22 = vstv %s279_s28  ;;  %s317_s15 = sld [smem:[#allocation2 + $0x302]] }
  0x1c   :  { %v68_v23 = vstv %s281_s29  ;;  %v55_v26 = vadd.f32 %v54_v19, %v51_v18  ;;  %v77_v30 = vstv %s288_s5  ;;  %v80_v31 = vstv %s290_s6  ;;  %s322_s16 = sld [smem:[#allocation2 + $0x400]]  ;;  %s335_s1 = sld [smem:[#allocation2 + $0x401]] }
  0x1d   :  { %v72_v24 = vstv %s286_s4  ;;  %v44_v25 = vadd.f32 %v43_v11, %v40_v17  ;;  %v69_v27 = vmul.f32 %v186_v1, %v68_v23  ;;  %v66_v29 = vadd.f32 %v65_v22, %v63_v21  ;;  %s326_s17 = sld [smem:[#allocation2 + $0x580]]  ;;  %s338_s20 = sld [smem:[#allocation2 + $0x481]] }
  0x1e   :  { %v73_v28 = vmul.f32 %v187_v2, %v72_v24  ;;  %v83_v32 = vstv %s292_s7  ;;  %v59_v34 = vadd.f32 %v58_v20, %v55_v26  ;;  %v87_v35 = vstv %s294_s0  ;;  %s328_s18 = sld [smem:[#allocation2 + $0x480]]  ;;  %s340_s21 = sld [smem:[#allocation2 + $0x402]] }
  0x1f   :  { %v45_v33 = vmax.f32 %v44_v25, 0.0  ;;  %v92_v36 = vstv %s296_s8  ;;  %v70_v37 = vadd.f32 %v69_v27, %v66_v29  ;;  %v95_v38 = vstv %s299_s9  ;;  %s333_s19 = sld [smem:[#allocation2 + $0x500]]  ;;  %s344_s22 = sld [smem:[#allocation2 + $0x581]] }
  0x20   :  { %v98_v39 = vstv %s301_s10  ;;  %v60_v41 = vmax.f32 %v59_v34, 0.0  ;;  %v107_v44 = vstv %s308_s12  ;;  %v110_v47 = vstv %s310_s13  ;;  %s346_s23 = sld [smem:[#allocation2 + $0x482]]  ;;  %s348_s24 = sld [smem:[#allocation2 + $0x501]] }
  0x21   :  { %v102_v40 = vstv %s306_s11  ;;  %v78_v42 = vmul.f32 %v77_v30, %v45_v33  ;;  %v93_v43 = vmul.f32 %v92_v36, %v45_v33  ;;  %v74_v45 = vadd.f32 %v73_v28, %v70_v37  ;;  %s350_s25 = sld [smem:[#allocation2 + $0x582]]  ;;  %s366_s27 = sld [smem:[#allocation2 + $0x600]] }
  0x22   :  { %v108_v46 = vmul.f32 %v107_v44, %v45_v33  ;;  %v113_v48 = vstv %s312_s14  ;;  %v84_v50 = vmul.f32 %v83_v32, %v60_v41  ;;  %v99_v52 = vmul.f32 %v98_v39, %v60_v41  ;;  %s353_s26 = sld [smem:[#allocation2 + $0x502]]  ;;  %s225_s28 = sld [smem:[#allocation2 + $0x680]] }
  0x23   :  { %v81_v49 = vadd.f32 %v80_v31, %v78_v42  ;;  %v96_v51 = vadd.f32 %v95_v38, %v93_v43  ;;  %v75_v53 = vmax.f32 %v74_v45, 0.0  ;;  %v114_v55 = vmul.f32 %v113_v48, %v60_v41  ;;  %s224_s29 = sld [smem:[#allocation2 + $0x780]] }
  0x24   :  { %v111_v54 = vadd.f32 %v110_v47, %v108_v46  ;;  %v117_v56 = vstv %s317_s15  ;;  %v122_v63 = vstv %s322_s16  ;;  %v125_v3 = vstv %s326_s17  ;;  %s226_s30 = sld [smem:[#allocation2 + $0x700]] }
  0x25   :  { %v85_v57 = vadd.f32 %v84_v50, %v81_v49  ;;  %v100_v58 = vadd.f32 %v99_v52, %v96_v51  ;;  %v88_v59 = vmul.f32 %v87_v35, %v75_v53  ;;  %v103_v60 = vmul.f32 %v102_v40, %v75_v53 }
  0x26   :  { %v115_v61 = vadd.f32 %v114_v55, %v111_v54  ;;  %v118_v62 = vmul.f32 %v117_v56, %v75_v53  ;;  %v128_v4 = vstv %s328_s18  ;;  %v137_v5 = vstv %s335_s1 }
  0x27   :  { %v89_v0 = vadd.f32 %v88_v59, %v85_v57  ;;  %v104_v1 = vadd.f32 %v103_v60, %v100_v58  ;;  %v143_v6 = vstv %s338_s20  ;;  %v152_v7 = vstv %s340_s21 }
  0x28   :  { %v119_v2 = vadd.f32 %v118_v62, %v115_v61  ;;  %v158_v11 = vstv %s346_s23  ;;  %v132_v12 = vstv %s333_s19  ;;  %v140_v13 = vstv %s344_s22 }
  0x29   :  { %v90_v8 = vmax.f32 %v89_v0, 0.0  ;;  %v105_v9 = vmax.f32 %v104_v1, 0.0  ;;  %v147_v14 = vstv %s348_s24  ;;  %v155_v15 = vstv %s350_s25 }
  0x2a   :  { %v120_v10 = vmax.f32 %v119_v2, 0.0  ;;  %v162_v19 = vstv %s353_s26  ;;  %v167_v35 = vstv %s366_s27  ;;  %v173_v36 = vstv %s225_s28 }
  0x2b   :  { %v123_v16 = vmul.f32 %v122_v63, %v90_v8  ;;  %v129_v17 = vmul.f32 %v128_v4, %v105_v9  ;;  %v138_v18 = vmul.f32 %v137_v5, %v90_v8  ;;  %v144_v20 = vmul.f32 %v143_v6, %v105_v9 }
  0x2c   :  { %v153_v21 = vmul.f32 %v152_v7, %v90_v8  ;;  %v159_v22 = vmul.f32 %v158_v11, %v105_v9  ;;  %v133_v24 = vmul.f32 %v132_v12, %v120_v10  ;;  %v148_v26 = vmul.f32 %v147_v14, %v120_v10 }
  0x2d   :  { %v126_v23 = vadd.f32 %v125_v3, %v123_v16  ;;  %v141_v25 = vadd.f32 %v140_v13, %v138_v18  ;;  %v163_v28 = vmul.f32 %v162_v19, %v120_v10  ;;  %v170_v40 = vstv %s224_s29 }
  0x2e   :  { %v156_v27 = vadd.f32 %v155_v15, %v153_v21  ;;  %v177_v41 = vstv %s226_s30 }
  0x2f   :  { %v130_v29 = vadd.f32 %v129_v17, %v126_v23  ;;  %v145_v30 = vadd.f32 %v144_v20, %v141_v25 }
  0x30   :  { %v160_v31 = vadd.f32 %v159_v22, %v156_v27 }
  0x31   :  { %v134_v32 = vadd.f32 %v133_v24, %v130_v29  ;;  %v149_v33 = vadd.f32 %v148_v26, %v145_v30 }
  0x32   :  { %v164_v34 = vadd.f32 %v163_v28, %v160_v31 }
  0x33   :  { %v135_v37 = vmax.f32 %v134_v32, 0.0  ;;  %v150_v38 = vmax.f32 %v149_v33, 0.0 }
  0x34   :  { %v165_v39 = vmax.f32 %v164_v34, 0.0 }
  0x35   :  { %v168_v42 = vmul.f32 %v167_v35, %v135_v37  ;;  %v174_v43 = vmul.f32 %v173_v36, %v150_v38 }
  0x36   :  { %v178_v45 = vmul.f32 %v177_v41, %v165_v39 }
  0x37   :  { %v171_v44 = vadd.f32 %v170_v40, %v168_v42 }
  0x39   :  { %v175_v46 = vadd.f32 %v174_v43, %v171_v44 }
  0x3b   :  { %v179_v47 = vadd.f32 %v178_v45, %v175_v46 }
  0x3d   :  { %180 = vst [vmem:[%s375_s2] sm:$0xff] %v179_v47 }
  0x3e   :  { %185 = vsyncpa [#allocation3], 1 }

</bundles_post_ra>
